<compile_context>
chip_gen: v7x
topology: tpu7x:2x2x1
jax: 0.10.0
libtpu: 0.0.40
codegen_flags: <defaults>
</compile_context>

<pallas_src>
import jax
import jax.numpy as jnp
from jax.experimental import pallas as pl
from jax.experimental.pallas import tpu as pltpu

EPS = 1e-12  # matches torch.nn.functional.normalize default eps


def _l2norm_kernel(x_ref, o_ref):
    # x_ref block: (T_B, C, T_HW) in VMEM.
    # Pass 1: sum of squares over the channel axis (whole C inside the block).
    xf = x_ref[...].astype(jnp.float32)
    ssq = jnp.sum(xf * xf, axis=1, keepdims=True)            # (T_B, 1, T_HW)
    del xf  # don't keep the full-block f32 upcast live across the reduce

    # 1 / max(sqrt(ssq), EPS) == rsqrt(max(ssq, EPS^2)); rsqrt runs on the EUP
    # over only the reduced (T_B, 1, T_HW) denominator.  EPS^2 is a normal f32.
    inv = jax.lax.rsqrt(jnp.maximum(ssq, jnp.float32(EPS * EPS)))

    # Pass 2: re-read x from VMEM (3 vld slots/cycle; nearly free) and scale.
    # Re-reading instead of reusing the bound upcast keeps vreg/VMEM pressure
    # flat as blocks grow to several MiB.
    o_ref[...] = (x_ref[...].astype(jnp.float32) * inv).astype(o_ref.dtype)


def _tpu_vmem_capacity_bytes():
    """Physical VMEM per TensorCore; conservative fallback if unavailable."""
    try:
        return int(pltpu.get_tpu_info().vmem_capacity_bytes)
    except Exception:
        return 64 << 20  # v7x per-TC size: the smallest of the supported chips


def _choose_tiles(B, C, HW, itemsize, budget, min_steps=8):
    """Pick (T_B, T_HW): biggest lane-dense block inside `budget` resident
    bytes while keeping >= min_steps grid steps (when the problem allows)."""
    # Resident estimate per block element:
    #   2 (double-buffer) x (in + out) x itemsize  +  ~1 f32 upcast temp.
    bytes_per_elem = 4 * itemsize + 4

    def fits(t_b, t_hw):
        return bytes_per_elem * t_b * C * t_hw <= budget

    # Lane-dense spatial tiles: multiples of 128 that divide HW exactly
    # (HW is already padded to a multiple of 128 by the caller).
    divisors = [d for d in range(128, HW + 1, 128) if HW % d == 0]
    fitting = [d for d in divisors if fits(1, d)]
    if not fitting:
        # Even a single 128-lane slab of all channels exceeds the budget
        # (extreme C).  Fall back to the smallest lane-dense tile.
        # TODO(synk): split C across grid steps with a scratch accumulator for
        # extreme channel counts; not needed for typical feature maps.
        fitting = [min(divisors)]

    # Prefer the largest tile that still leaves >= min_steps grid steps so
    # v7x's two TensorCores both get work and the pipeline can overlap DMA.
    good = [d for d in fitting if B * (HW // d) >= min_steps]
    t_hw = max(good) if good else max(fitting)

    # Pack batch elements while blocks stay in budget.  Stop once the grid
    # would drop below min_steps, unless the block is still tiny (< 512 KiB,
    # overhead-dominated regime where parallelism is irrelevant anyway).
    t_b = 1
    while True:
        nb = 2 * t_b
        if B % nb != 0 or not fits(nb, t_hw):
            break
        steps_after = (B // nb) * (HW // t_hw)
        block_bytes_after = nb * C * t_hw * itemsize
        if steps_after < min_steps and block_bytes_after >= (512 << 10):
            break
        t_b = nb
    return t_b, t_hw


def l2norm(x):
    """L2-normalize over channel axis (dim=1) of an NCHW tensor."""
    B, C, H, W = x.shape
    HW = H * W
    itemsize = jnp.dtype(x.dtype).itemsize
    x_flat = x.reshape(B, C, HW)

    # Pad the spatial axis up to a multiple of 128 so every tile is
    # lane-dense (pad columns are independent positions: their normalized
    # value is 0 and they are sliced off below).
    HW_pad = ((HW + 127) // 128) * 128
    if HW_pad != HW:
        x_flat = jnp.pad(x_flat, ((0, 0), (0, 0), (0, HW_pad - HW)))

    # Generation-aware resident-bytes budget: ~40% of physical VMEM, capped.
    cap = _tpu_vmem_capacity_bytes()
    budget = min(40 << 20, int(cap * 0.4))

    t_b, t_hw = _choose_tiles(B, C, HW_pad, itemsize, budget)
    grid = (B // t_b, HW_pad // t_hw)

    # Scoped-VMEM limit: cover the pipelined buffers + headroom explicitly
    # instead of relying on the (generation-dependent) scoped default.
    resident = (4 * itemsize + 4) * t_b * C * t_hw
    vmem_limit = int(max(16 << 20, min(cap * 3 // 4, resident + (8 << 20))))

    cost = pl.CostEstimate(
        flops=3 * B * C * HW_pad,              # square, add, scale
        transcendentals=B * HW_pad,            # one rsqrt per (b, hw) position
        bytes_accessed=2 * B * C * HW_pad * itemsize,
    )

    out_flat = pl.pallas_call(
        _l2norm_kernel,
        out_shape=jax.ShapeDtypeStruct((B, C, HW_pad), x.dtype),
        grid_spec=pltpu.PrefetchScalarGridSpec(
            num_scalar_prefetch=0,
            grid=grid,
            # pipeline_mode=pl.Buffered(3) on the input is a possible sweep if
            # a profile shows exposed DMA at small block sizes; default 2 kept.
            in_specs=[pl.BlockSpec((t_b, C, t_hw), lambda b, s: (b, 0, s))],
            out_specs=pl.BlockSpec((t_b, C, t_hw), lambda b, s: (b, 0, s)),
        ),
        compiler_params=pltpu.CompilerParams(
            dimension_semantics=("parallel", "parallel"),
            vmem_limit_bytes=vmem_limit),
        cost_estimate=cost,
    )(x_flat)

    if HW_pad != HW:
        out_flat = out_flat[:, :, :HW]
    return out_flat.reshape(B, C, H, W)


def _reference(x):
    denom = jnp.maximum(jnp.sqrt(jnp.sum(x * x, axis=1, keepdims=True)), EPS)
    return x / denom


if __name__ == "__main__":
    key = jax.random.PRNGKey(0)

    # Small shape consistent with a conv-feature map: B=2, C=4, H=W=16.
    x = jax.random.normal(key, (2, 4, 16, 16), dtype=jnp.float32)
    y = jax.block_until_ready(l2norm(x))
    assert jnp.allclose(y, _reference(x), atol=1e-5, rtol=1e-5), \
        "mismatch vs reference"

    # Exercise the HW % 128 != 0 padding path as well.
    x2 = jax.random.normal(jax.random.PRNGKey(1), (2, 4, 5, 6),
                           dtype=jnp.float32)
    y2 = jax.block_until_ready(l2norm(x2))
    assert jnp.allclose(y2, _reference(x2), atol=1e-5, rtol=1e-5), \
        "mismatch vs reference (padded path)"

    print("KERNEL_OK")
</pallas_src>

<mosaic_0001>
module attributes {stable_mosaic.version = 11 : i64} {
  func.func @_l2norm_kernel(%arg0: i32, %arg1: i32, %arg2: memref<2x4x256xf32, #tpu.memory_space<vmem>>, %arg3: memref<2x4x256xf32, #tpu.memory_space<vmem>>) attributes {dimension_semantics = [#tpu.dimension_semantics<parallel>, #tpu.dimension_semantics<parallel>], iteration_bounds = array<i64: 1, 1>, scalar_prefetch = 0 : i64, scratch_operands = 0 : i64, tpu.core_type = #tpu.core_type<tc>, window_params = [{transform_indices = @transform_0, window_bounds = array<i64: 2, 4, 256>}, {transform_indices = @transform_1, window_bounds = array<i64: 2, 4, 256>}]} {
    %c0 = arith.constant 0 : index
    %c0_0 = arith.constant 0 : index
    %c0_1 = arith.constant 0 : index
    %0 = vector.load %arg2[%c0, %c0_0, %c0_1] : memref<2x4x256xf32, #tpu.memory_space<vmem>>, vector<2x4x256xf32>
    %1 = arith.mulf %0, %0 : vector<2x4x256xf32>
    %cst = arith.constant dense<0.000000e+00> : vector<2x256xf32>
    %2 = vector.multi_reduction <add>, %1, %cst [1] : vector<2x4x256xf32> to vector<2x256xf32>
    %3 = vector.shape_cast %2 : vector<2x256xf32> to vector<2x1x256xf32>
    %cst_2 = arith.constant 1.000000e-24 : f32
    %4 = vector.broadcast %cst_2 : f32 to vector<2x1x256xf32>
    %5 = arith.maximumf %3, %4 : vector<2x1x256xf32>
    %6 = math.rsqrt %5 : vector<2x1x256xf32>
    %c0_3 = arith.constant 0 : index
    %c0_4 = arith.constant 0 : index
    %c0_5 = arith.constant 0 : index
    %7 = vector.load %arg2[%c0_3, %c0_4, %c0_5] : memref<2x4x256xf32, #tpu.memory_space<vmem>>, vector<2x4x256xf32>
    %8 = vector.broadcast %6 : vector<2x1x256xf32> to vector<2x4x256xf32>
    %9 = arith.mulf %7, %8 : vector<2x4x256xf32>
    %c0_6 = arith.constant 0 : index
    %c0_7 = arith.constant 0 : index
    %c0_8 = arith.constant 0 : index
    %10 = vector.load %arg3[%c0_6, %c0_7, %c0_8] : memref<2x4x256xf32, #tpu.memory_space<vmem>>, vector<2x4x256xf32>
    tpu.vector_store %arg3[%c0_6, %c0_7, %c0_8], %9 {strides = array<i32>} : memref<2x4x256xf32, #tpu.memory_space<vmem>>, vector<2x4x256xf32>,
    return
  }
  func.func @transform_0(%arg0: i32, %arg1: i32) -> (i32, i32, i32) {
    %c0_i32 = arith.constant 0 : i32
    %c0_i32_0 = arith.constant 0 : i32
    return %arg0, %c0_i32, %arg1 : i32, i32, i32
  }
  func.func @transform_1(%arg0: i32, %arg1: i32) -> (i32, i32, i32) {
    %c0_i32 = arith.constant 0 : i32
    %c0_i32_0 = arith.constant 0 : i32
    return %arg0, %c0_i32, %arg1 : i32, i32, i32
  }
}

</mosaic_0001>

<bundles_post_ra>
// kernel: tpu_custom_call.1
= control target key start
LH: loop header
LB: loop body
LE: loop exit
PB: predicated region body
PF: predicated region fallthrough
CT: control target
= control target key end

     0   :  { %6 = vsyncpa [#allocation3], 0  ;;  %s203_s0 = inlined_call_operand.hbm [shape: f32[2,4,256], index: 0, kind: input, shape index: {}]   ;;  %s204_s1 = inlined_call_operand.hbm [shape: f32[2,4,256], index: 1, kind: output, shape index: {}]  }
   0x1   :  { %7 = vsyncpa [#allocation4], 0  ;;  %s159_s6 = smov [#allocation2]   ;;  %s111_s10 = scalar_lea.hbm %s203_s0, 256 }
   0x2   :  { %s13_s7 = sshll.u32 %s159_s6, 4  ;;  %p112_p0 = scmp.ne.s32.totalorder %s203_s0, %s111_s10  ;;  %s14_s7 = int_to_ptr.vmem [resolvable:$true] %s13_s7 }
   0x3   :  { %p115_p1 = scmp.lt.u32.totalorder %s111_s10, %s203_s0 }
   0x5   :  { %p117_p2 = pnand %p115_p1, %p112_p0 }
   0x7   :  { %120 = shalt.err (!%p117_p2)
}
   0x8   :  { %s121_s15 = scalar_lea.vmem %s14_s7, 256  ;;  %p126_p4 = scmp.lt.s32.totalorder %s14_s7, %s14_s7 }
   0x9   :  { %p122_p3 = scmp.ne.s32.totalorder %s14_s7, %s121_s15  ;;  %p127_p5 = scmp.lt.s32.totalorder %s121_s15, %s121_s15 }
   0xb   :  { %p128_p6 = por %p127_p5, %p126_p4 }
   0xd   :  { %p129_p7 = pnand %p128_p6, %p122_p3 }
   0xf   :  { %132 = shalt.err (!%p129_p7)
}
  0x10   :  { %s160_s16 = smov 128   ;;  %s161_s17 = smov 8  }
  0x11   :  { %19 = dma.hbm_to_vmem [thread:$0]  %s203_s0, 256, %s14_s7, [#allocation3], %s160_s16, %s160_s16, %s161_s17  }
  0x12   :  { %155 = dma.done.wait [#allocation3], 256  }
  0x13   :  { %156 = vsyncadd [#allocation3], 4294967040  ;;  %v23_v0 = vld [vmem:[#allocation2] sm:$0xff]  ;;  %vm33_vm0 = vcmask 1043456   ;;  %v24_v1 = vld [vmem:[#allocation2 + $0x8] sm:$0xff]  ;;  %s162_s0 = smov [#allocation5]  }
  0x14   :  { %v25_v2 = vmul.f32 %v23_v0, %v23_v0  ;;  %v26_v3 = vmul.f32 %v24_v1, %v24_v1  ;;  %s87_s20 = sshll.u32 %s162_s0, 4  ;;  %s88_s20 = int_to_ptr.vmem [resolvable:$true] %s87_s20 }
  0x15   :  { %s133_s21 = scalar_lea.vmem %s88_s20, 256  ;;  %p138_p9 = scmp.lt.s32.totalorder %s88_s20, %s88_s20 }
  0x16   :  { %v29_v4 = vcombine.high %v25_v2, %v25_v2  ;;  %v34_v5 = vsel %vm33_vm0, %v25_v2, 0.0  ;;  %v30_v6 = vcombine.high %v26_v3, %v26_v3  ;;  %v48_v7 = vsel %vm33_vm0, %v26_v3, 0.0  ;;  %p134_p8 = scmp.ne.s32.totalorder %s88_s20, %s133_s21  ;;  %p139_p10 = scmp.lt.s32.totalorder %s133_s21, %s133_s21 }
  0x17   :  { %v35_v8 = vrot.slane %v34_v5, 4  ;;  %v49_v9 = vrot.slane %v48_v7, 4 }
  0x18   :  { %v41_v10 = vsel %vm33_vm0, %v29_v4, 0.0  ;;  %v55_v11 = vsel %vm33_vm0, %v30_v6, 0.0  ;;  %p140_p11 = por %p139_p10, %p138_p9 }
  0x19   :  { %v36_v12 = vadd.f32 %v35_v8, %v34_v5  ;;  %v42_v13 = vrot.slane %v41_v10, 4  ;;  %v50_v14 = vadd.f32 %v49_v9, %v48_v7  ;;  %v56_v15 = vrot.slane %v55_v11, 4 }
  0x1a   :  { %p141_p12 = pnand %p140_p11, %p134_p8 }
  0x1b   :  { %v37_v16 = vrot.slane %v36_v12, 2  ;;  %v43_v17 = vadd.f32 %v42_v13, %v41_v10  ;;  %v51_v18 = vrot.slane %v50_v14, 2  ;;  %v57_v19 = vadd.f32 %v56_v15, %v55_v11 }
  0x1d   :  { %v38_v20 = vadd.f32 %v37_v16, %v36_v12  ;;  %v44_v21 = vrot.slane %v43_v17, 2  ;;  %v52_v22 = vadd.f32 %v51_v18, %v50_v14  ;;  %v58_v23 = vrot.slane %v57_v19, 2 }
  0x1f   :  { %v39_v24 = vrot.slane %v38_v20, 1  ;;  %v45_v25 = vadd.f32 %v44_v21, %v43_v17  ;;  %v53_v26 = vrot.slane %v52_v22, 1  ;;  %v59_v27 = vadd.f32 %v58_v23, %v57_v19 }
  0x21   :  { %v40_v28 = vadd.f32 %v39_v24, %v38_v20  ;;  %v46_v29 = vrot.slane %v45_v25, 1  ;;  %v54_v30 = vadd.f32 %v53_v26, %v52_v22  ;;  %v60_v31 = vrot.slane %v59_v27, 1 }
  0x23   :  { %v47_v32 = vadd.f32 %v46_v29, %v45_v25  ;;  %v62_v33 = vmax.f32 %v40_v28, 1e-24  ;;  %v61_v34 = vadd.f32 %v60_v31, %v59_v27  ;;  %v64_v35 = vmax.f32 %v54_v30, 1e-24 }
  0x25   :  { %v63_v36 = vmax.f32 %v47_v32, 1e-24  ;;  %103 = vrsqrt.f32 %v62_v33  ;;  %v65_v37 = vmax.f32 %v61_v34, 1e-24 }
  0x26   :  { %105 = vrsqrt.f32 %v64_v35 }
  0x27   :  { %107 = vrsqrt.f32 %v63_v36 }
  0x28   :  { %109 = vrsqrt.f32 %v65_v37 }
  0x2f   :  { %v104_v38 = vpop.eup %103 }
  0x30   :  { %v106_v39 = vpop.eup %105 }
  0x31   :  { %v108_v40 = vpop.eup %107 }
  0x32   :  { %v110_v41 = vpop.eup %109  ;;  %v74_v42 = vcombine.low %v104_v38, %v108_v40 }
  0x33   :  { %v75_v43 = vcombine.low %v106_v39, %v110_v41 }
  0x34   :  { %v78_v44 = vmul.f32 %v74_v42, %v23_v0 }
  0x35   :  { %v79_v45 = vmul.f32 %v75_v43, %v24_v1 }
  0x36   :  { %80 = vst [vmem:[#allocation5] sm:$0xff] %v78_v44 }
  0x37   :  { %81 = vst [vmem:[#allocation5 + $0x8] sm:$0xff] %v79_v45 }
  0x38   :  { %144 = shalt.err (!%p141_p12)
}
  0x39   :  { %s145_s24 = scalar_lea.hbm %s204_s1, 256 }
  0x3a   :  { %p146_p13 = scmp.ne.s32.totalorder %s204_s1, %s145_s24  ;;  %p149_p0 = scmp.lt.u32.totalorder %s145_s24, %s204_s1 }
  0x3c   :  { %p151_p1 = pnand %p149_p0, %p146_p13 }
  0x3e   :  { %154 = shalt.err (!%p151_p1)
}
  0x3f   :  { %93 = dma.vmem_to_hbm [thread:$0]  %s88_s20, 256, %s204_s1, [#allocation4], %s160_s16, %s160_s16, %s161_s17  }
  0x40   :  { %157 = dma.done.wait [#allocation4], 256  }
  0x41   :  { %158 = vsyncadd [#allocation4], 4294967040 }
  0x42   :  { %97 = vsyncpa [#allocation3], 1 }
  0x43   :  { %98 = vsyncpa [#allocation4], 1 }

</bundles_post_ra>
